<compile_context>
chip_gen: v7x
topology: tpu7x:2x2x1
jax: 0.10.0
libtpu: 0.0.40
codegen_flags: <defaults>
</compile_context>

<pallas_src>
import functools
import math

import jax
import jax.numpy as jnp
from jax import lax
from jax.experimental import pallas as pl
from jax.experimental.pallas import tpu as pltpu


def _round_up(x, m):
    return (x + m - 1) // m * m


# --------------------------------------------------------------------------
# Prologue: row-wise L2 normalize, positives, fold 1/sqrt(T), cast to bf16.
# --------------------------------------------------------------------------
def _normalize_kernel(emb_i_ref, emb_j_ref, zi_ref, zj_ref, pos_ref, *,
                      scale, out_dtype):
    eps = jnp.float32(1e-12)                      # torch F.normalize eps
    xi = emb_i_ref[...].astype(jnp.float32)
    xj = emb_j_ref[...].astype(jnp.float32)
    ni = jnp.sqrt(jnp.sum(xi * xi, axis=1, keepdims=True))
    nj = jnp.sqrt(jnp.sum(xj * xj, axis=1, keepdims=True))
    zi = xi / jnp.maximum(ni, eps)
    zj = xj / jnp.maximum(nj, eps)
    # positives[k] = <z_i[k], z_j[k]> in f32 (same value for both halves).
    pos_ref[...] = jnp.sum(zi * zj, axis=1, keepdims=True)
    s = jnp.float32(scale)                        # 1/sqrt(T) folded into both sides
    zi_ref[...] = (zi * s).astype(out_dtype)
    zj_ref[...] = (zj * s).astype(out_dtype)


# --------------------------------------------------------------------------
# Main kernel: column-tile reduction of the (never materialized) 2Bx2B sims.
# --------------------------------------------------------------------------
def _contrastive_kernel(zi_row_ref, zj_row_ref, zi_col_ref, zj_col_ref,
                        pos_ref,                       # inputs
                        out_ref,                       # output
                        z_rows_ref, acc_ref,           # scratch
                        *, tile_m, tile_n, inv_temperature, batch, n_pad):
    r = pl.program_id(0)                 # row-tile index   (parallel)
    c = pl.program_id(1)                 # col-tile index   (reduction)

    @pl.when(c == 0)
    def _init():
        # Stack the (already normalized, already 1/sqrt(T)-scaled) row halves
        # into one contiguous (2*tm, D) operand so only two matmuls are needed.
        z_rows_ref[0:tile_m, :] = zi_row_ref[...]
        z_rows_ref[tile_m:2 * tile_m, :] = zj_row_ref[...]
        acc_ref[...] = jnp.zeros_like(acc_ref)

    rows = z_rows_ref[...]               # (2*tm, D)  matmul_dtype
    ci = zi_col_ref[...]                 # (tn, D)
    cj = zj_col_ref[...]                 # (tn, D)

    # Contract the feature dim of both operands (no explicit transpose);
    # f32 accumulation on the MXU.  Results are already sim/T.
    dn = (((1,), (1,)), ((), ()))
    s_left = lax.dot_general(rows, ci, dn, preferred_element_type=jnp.float32)
    s_right = lax.dot_general(rows, cj, dn, preferred_element_type=jnp.float32)
    e_left = jnp.exp(s_left)             # (2*tm, tn)
    e_right = jnp.exp(s_right)

    # Does this tile's row range intersect its column range?  Only then can
    # the global diagonal (self-similarity) land inside this tile.
    overlaps = jnp.logical_and(r * tile_m < (c + 1) * tile_n,
                               c * tile_n < (r + 1) * tile_m)

    @pl.when(jnp.logical_not(overlaps))
    def _acc_plain():
        # VPU add first, then ONE XLU row-sum (halved cross-lane work).
        acc_ref[...] += jnp.sum(e_left + e_right, axis=1, keepdims=True)

    @pl.when(overlaps)
    def _acc_masked():
        shp = (2 * tile_m, tile_n)
        a = lax.broadcasted_iota(jnp.int32, shp, 0)
        b = lax.broadcasted_iota(jnp.int32, shp, 1)
        gcol = c * tile_n + b
        zero = jnp.float32(0.0)
        # i-half rows vs i columns (ii block) and j-half rows vs j columns
        # (jj block) are the only places the 2Bx2B diagonal appears.
        diag_i = jnp.logical_and(a < tile_m, r * tile_m + a == gcol)
        diag_j = jnp.logical_and(a >= tile_m,
                                 r * tile_m + (a - tile_m) == gcol)
        el = jnp.where(diag_i, zero, e_left)
        er = jnp.where(diag_j, zero, e_right)
        acc_ref[...] += jnp.sum(el + er, axis=1, keepdims=True)

    @pl.when(c == pl.num_programs(1) - 1)
    def _finalize():
        acc = acc_ref[...]                         # (2*tm, 1)
        if n_pad:
            # Every zero-padded column contributed exactly exp(0) = 1.
            acc = acc - jnp.float32(2 * n_pad)
        pos_t = pos_ref[...] * jnp.float32(inv_temperature)   # (tm, 1) f32
        # Log-domain loss: -log(exp(pos/T)/denom) == log(denom) - pos/T.
        li = jnp.log(acc[0:tile_m]) - pos_t
        lj = jnp.log(acc[tile_m:2 * tile_m]) - pos_t
        if n_pad:
            row_ids = r * tile_m + lax.broadcasted_iota(
                jnp.int32, (tile_m, 1), 0)
            valid = row_ids < batch
            li = jnp.where(valid, li, 0.0)
            lj = jnp.where(valid, lj, 0.0)
        total = jnp.sum(li + lj)
        # Lane-dense (1,8,128) write -> unmasked vector store.
        out_ref[...] = jnp.broadcast_to(total, out_ref.shape).astype(
            out_ref.dtype)


# --------------------------------------------------------------------------
# Wrapper
# --------------------------------------------------------------------------
def _pick_row_tile(batch, block_rows, min_tile):
    block_rows = max(min_tile, _round_up(int(block_rows), min_tile))
    if batch >= 2 * min_tile:
        # Guarantee >= 2 row tiles so v7x's second TensorCore gets work.
        half = _round_up(-(-batch // 2), min_tile)
        return min(block_rows, half)
    return _round_up(max(batch, 1), min_tile)


def contrastive_loss(emb_i, emb_j, *, temperature=0.05, block_rows=512,
                     block_cols=None, matmul_dtype=jnp.bfloat16,
                     column_buffers=2):
    """NT-Xent contrastive loss matching the PyTorch ContrastiveLoss.forward."""
    assert emb_i.shape == emb_j.shape and emb_i.ndim == 2
    batch, feat = emb_i.shape

    itemsize = jnp.dtype(matmul_dtype).itemsize
    min_tile = 8 if itemsize >= 4 else 16          # keep bf16 tiles 16-aligned
    tm = _pick_row_tile(batch, block_rows, min_tile)
    b_pad = _round_up(batch, tm)
    n_pad = b_pad - batch
    num_r = b_pad // tm
    if (block_cols is not None and int(block_cols) % min_tile == 0
            and b_pad % int(block_cols) == 0):
        tn = int(block_cols)
    else:
        tn = tm
    num_c = b_pad // tn

    if n_pad:
        emb_i = jnp.pad(emb_i, ((0, n_pad), (0, 0)))
        emb_j = jnp.pad(emb_j, ((0, n_pad), (0, 0)))

    scale = 1.0 / math.sqrt(float(temperature))
    inv_t = 1.0 / float(temperature)

    # ---- Prologue: normalize once, fold 1/sqrt(T), compute positives (f32).
    norm_kernel = functools.partial(_normalize_kernel, scale=scale,
                                    out_dtype=matmul_dtype)
    zi, zj, pos = pl.pallas_call(
        norm_kernel,
        out_shape=(jax.ShapeDtypeStruct((b_pad, feat), matmul_dtype),
                   jax.ShapeDtypeStruct((b_pad, feat), matmul_dtype),
                   jax.ShapeDtypeStruct((b_pad, 1), jnp.float32)),
        grid_spec=pltpu.PrefetchScalarGridSpec(
            num_scalar_prefetch=0,
            grid=(num_r,),
            in_specs=[pl.BlockSpec((tm, feat), lambda r: (r, 0)),
                      pl.BlockSpec((tm, feat), lambda r: (r, 0))],
            out_specs=[pl.BlockSpec((tm, feat), lambda r: (r, 0)),
                       pl.BlockSpec((tm, feat), lambda r: (r, 0)),
                       pl.BlockSpec((tm, 1), lambda r: (r, 0))],
        ),
        compiler_params=pltpu.CompilerParams(
            dimension_semantics=("parallel",)),
    )(emb_i, emb_j)

    # ---- Main kernel.
    main_kernel = functools.partial(
        _contrastive_kernel, tile_m=tm, tile_n=tn, inv_temperature=inv_t,
        batch=batch, n_pad=n_pad)

    col_bufs = max(2, int(column_buffers))
    # Explicit VMEM budget (f32 matmul/exp temporaries dominate); cap at
    # 48 MiB so it stays safe on v7x (64 MiB physical VMEM per TensorCore).
    vmem_est = (
        6 * (2 * tm) * tn * 4                      # f32 s/e temporaries
        + 2 * 2 * tm * feat * itemsize             # double-buffered row tiles
        + 2 * col_bufs * tn * feat * itemsize      # buffered column tiles
        + (2 * tm) * feat * itemsize               # stacked-row scratch
        + (2 * tm) * 4 + 2 * 2 * tm * 4            # acc + pos buffers
        + 2 * 8 * 128 * 4)                         # output block
    vmem_limit = int(min(max(2 * vmem_est, 32 * 1024 * 1024),
                         48 * 1024 * 1024))

    col_kwargs = {}
    if col_bufs != 2:                              # e.g. Buffered(3) on v5e
        col_kwargs = dict(pipeline_mode=pl.Buffered(col_bufs))
    col_spec_i = pl.BlockSpec((tn, feat), lambda r, c: (c, 0), **col_kwargs)
    col_spec_j = pl.BlockSpec((tn, feat), lambda r, c: (c, 0), **col_kwargs)

    partial_losses = pl.pallas_call(
        main_kernel,
        out_shape=jax.ShapeDtypeStruct((num_r, 8, 128), jnp.float32),
        grid_spec=pltpu.PrefetchScalarGridSpec(
            num_scalar_prefetch=0,
            grid=(num_r, num_c),
            in_specs=[
                pl.BlockSpec((tm, feat), lambda r, c: (r, 0)),   # z_i row tile
                pl.BlockSpec((tm, feat), lambda r, c: (r, 0)),   # z_j row tile
                col_spec_i,                                      # z_i col tile
                col_spec_j,                                      # z_j col tile
                pl.BlockSpec((tm, 1), lambda r, c: (r, 0)),      # positives
            ],
            out_specs=pl.BlockSpec((1, 8, 128), lambda r, c: (r, 0, 0)),
            scratch_shapes=[
                pltpu.VMEM((2 * tm, feat), matmul_dtype),  # stacked [z_i; z_j]
                pltpu.VMEM((2 * tm, 1), jnp.float32),      # denominator acc
            ],
        ),
        compiler_params=pltpu.CompilerParams(
            dimension_semantics=("parallel", "arbitrary"),
            vmem_limit_bytes=vmem_limit),
    )(zi, zj, zi, zj, pos)

    # Tiny cross-row-tile reduction + mean over the 2B real rows (pure glue).
    return jnp.sum(partial_losses[:, 0, 0]) / jnp.float32(2 * batch)


# --------------------------------------------------------------------------
# Pure-JAX reference mirroring the PyTorch module (sanity check only).
# --------------------------------------------------------------------------
def _reference_loss(emb_i, emb_j, temperature=0.05):
    eps = 1e-12

    def normalize(x):
        n = jnp.sqrt(jnp.sum(x * x, axis=1, keepdims=True))
        return x / jnp.maximum(n, eps)

    b = emb_i.shape[0]
    z = jnp.concatenate([normalize(emb_i), normalize(emb_j)], axis=0)
    sim = z @ z.T
    sim_ij = jnp.diagonal(sim, offset=b)
    sim_ji = jnp.diagonal(sim, offset=-b)
    positives = jnp.concatenate([sim_ij, sim_ji], axis=0)
    nominator = jnp.exp(positives / temperature)
    neg_mask = 1.0 - jnp.eye(2 * b, dtype=jnp.float32)
    denominator = jnp.sum(neg_mask * jnp.exp(sim / temperature), axis=1)
    return jnp.sum(-jnp.log(nominator / denominator)) / (2 * b)


if __name__ == "__main__":
    batch_size = 8
    feat = 32
    key = jax.random.PRNGKey(0)
    ki, kj = jax.random.split(key)
    emb_i = jax.random.normal(ki, (batch_size, feat), dtype=jnp.float32)
    emb_j = jax.random.normal(kj, (batch_size, feat), dtype=jnp.float32)

    ref = _reference_loss(emb_i, emb_j, temperature=0.05)

    # f32-MXU validation path (no padding for B=8).
    loss_f32 = contrastive_loss(emb_i, emb_j, temperature=0.05,
                                matmul_dtype=jnp.float32)
    jax.block_until_ready(loss_f32)
    assert jnp.allclose(loss_f32, ref, rtol=1e-2, atol=1e-2), (loss_f32, ref)

    # Default bf16-operand path (internally pads B=8 -> 16 rows).
    loss_bf16 = contrastive_loss(emb_i, emb_j, temperature=0.05)
    jax.block_until_ready(loss_bf16)
    assert jnp.allclose(loss_bf16, ref, rtol=8e-2, atol=8e-2), (loss_bf16, ref)

    # Multi-tile + padded path (B=24 -> tm=16, b_pad=32, 2x2 grid).
    b2 = 24
    e2i = jax.random.normal(jax.random.PRNGKey(1), (b2, feat), jnp.float32)
    e2j = jax.random.normal(jax.random.PRNGKey(2), (b2, feat), jnp.float32)
    ref2 = _reference_loss(e2i, e2j, temperature=0.05)
    loss2_f32 = contrastive_loss(e2i, e2j, temperature=0.05,
                                 matmul_dtype=jnp.float32)
    jax.block_until_ready(loss2_f32)
    assert jnp.allclose(loss2_f32, ref2, rtol=1e-2, atol=1e-2), (loss2_f32, ref2)
    loss2_bf16 = contrastive_loss(e2i, e2j, temperature=0.05)
    jax.block_until_ready(loss2_bf16)
    assert jnp.allclose(loss2_bf16, ref2, rtol=8e-2, atol=8e-2), (loss2_bf16, ref2)

    print("KERNEL_OK")
</pallas_src>

<mosaic_0001>
module attributes {stable_mosaic.version = 11 : i64} {
  func.func @_normalize_kernel(%arg0: i32, %arg1: memref<8x32xf32, #tpu.memory_space<vmem>>, %arg2: memref<8x32xf32, #tpu.memory_space<vmem>>, %arg3: memref<8x32xf32, #tpu.memory_space<vmem>>, %arg4: memref<8x32xf32, #tpu.memory_space<vmem>>, %arg5: memref<8x1xf32, #tpu.memory_space<vmem>>) attributes {dimension_semantics = [#tpu.dimension_semantics<parallel>], iteration_bounds = array<i64: 1>, scalar_prefetch = 0 : i64, scratch_operands = 0 : i64, tpu.core_type = #tpu.core_type<tc>, window_params = [{transform_indices = @transform_0, window_bounds = array<i64: 8, 32>}, {transform_indices = @transform_1, window_bounds = array<i64: 8, 32>}, {transform_indices = @transform_2, window_bounds = array<i64: 8, 32>}, {transform_indices = @transform_3, window_bounds = array<i64: 8, 32>}, {transform_indices = @transform_4, window_bounds = array<i64: 8, 1>}]} {
    %c0 = arith.constant 0 : index
    %c0_0 = arith.constant 0 : index
    %0 = vector.load %arg1[%c0, %c0_0] : memref<8x32xf32, #tpu.memory_space<vmem>>, vector<8x32xf32>
    %c0_1 = arith.constant 0 : index
    %c0_2 = arith.constant 0 : index
    %1 = vector.load %arg2[%c0_1, %c0_2] : memref<8x32xf32, #tpu.memory_space<vmem>>, vector<8x32xf32>
    %2 = arith.mulf %0, %0 : vector<8x32xf32>
    %cst = arith.constant dense<0.000000e+00> : vector<8xf32>
    %3 = vector.multi_reduction <add>, %2, %cst [1] : vector<8x32xf32> to vector<8xf32>
    %4 = vector.shape_cast %3 : vector<8xf32> to vector<8x1xf32>
    %5 = math.sqrt %4 : vector<8x1xf32>
    %6 = arith.mulf %1, %1 : vector<8x32xf32>
    %cst_3 = arith.constant dense<0.000000e+00> : vector<8xf32>
    %7 = vector.multi_reduction <add>, %6, %cst_3 [1] : vector<8x32xf32> to vector<8xf32>
    %8 = vector.shape_cast %7 : vector<8xf32> to vector<8x1xf32>
    %9 = math.sqrt %8 : vector<8x1xf32>
    %cst_4 = arith.constant 9.99999996E-13 : f32
    %10 = vector.broadcast %cst_4 : f32 to vector<8x1xf32>
    %11 = arith.maximumf %5, %10 : vector<8x1xf32>
    %12 = vector.broadcast %11 : vector<8x1xf32> to vector<8x32xf32>
    %13 = arith.divf %0, %12 : vector<8x32xf32>
    %cst_5 = arith.constant 9.99999996E-13 : f32
    %14 = vector.broadcast %cst_5 : f32 to vector<8x1xf32>
    %15 = arith.maximumf %9, %14 : vector<8x1xf32>
    %16 = vector.broadcast %15 : vector<8x1xf32> to vector<8x32xf32>
    %17 = arith.divf %1, %16 : vector<8x32xf32>
    %18 = arith.mulf %13, %17 : vector<8x32xf32>
    %cst_6 = arith.constant dense<0.000000e+00> : vector<8xf32>
    %19 = vector.multi_reduction <add>, %18, %cst_6 [1] : vector<8x32xf32> to vector<8xf32>
    %20 = vector.shape_cast %19 : vector<8xf32> to vector<8x1xf32>
    %c0_7 = arith.constant 0 : index
    %c0_8 = arith.constant 0 : index
    %21 = vector.load %arg5[%c0_7, %c0_8] : memref<8x1xf32, #tpu.memory_space<vmem>>, vector<8x1xf32>
    tpu.vector_store %arg5[%c0_7, %c0_8], %20 {strides = array<i32>} : memref<8x1xf32, #tpu.memory_space<vmem>>, vector<8x1xf32>,
    %cst_9 = arith.constant 4.47213602 : f32
    %22 = vector.broadcast %cst_9 : f32 to vector<8x32xf32>
    %23 = arith.mulf %13, %22 : vector<8x32xf32>
    %c0_10 = arith.constant 0 : index
    %c0_11 = arith.constant 0 : index
    %24 = vector.load %arg3[%c0_10, %c0_11] : memref<8x32xf32, #tpu.memory_space<vmem>>, vector<8x32xf32>
    tpu.vector_store %arg3[%c0_10, %c0_11], %23 {strides = array<i32>} : memref<8x32xf32, #tpu.memory_space<vmem>>, vector<8x32xf32>,
    %cst_12 = arith.constant 4.47213602 : f32
    %25 = vector.broadcast %cst_12 : f32 to vector<8x32xf32>
    %26 = arith.mulf %17, %25 : vector<8x32xf32>
    %c0_13 = arith.constant 0 : index
    %c0_14 = arith.constant 0 : index
    %27 = vector.load %arg4[%c0_13, %c0_14] : memref<8x32xf32, #tpu.memory_space<vmem>>, vector<8x32xf32>
    tpu.vector_store %arg4[%c0_13, %c0_14], %26 {strides = array<i32>} : memref<8x32xf32, #tpu.memory_space<vmem>>, vector<8x32xf32>,
    return
  }
  func.func @transform_0(%arg0: i32) -> (i32, i32) {
    %c0_i32 = arith.constant 0 : i32
    %c0_i32_0 = arith.constant 0 : i32
    return %arg0, %c0_i32 : i32, i32
  }
  func.func @transform_1(%arg0: i32) -> (i32, i32) {
    %c0_i32 = arith.constant 0 : i32
    %c0_i32_0 = arith.constant 0 : i32
    return %arg0, %c0_i32 : i32, i32
  }
  func.func @transform_2(%arg0: i32) -> (i32, i32) {
    %c0_i32 = arith.constant 0 : i32
    %c0_i32_0 = arith.constant 0 : i32
    return %arg0, %c0_i32 : i32, i32
  }
  func.func @transform_3(%arg0: i32) -> (i32, i32) {
    %c0_i32 = arith.constant 0 : i32
    %c0_i32_0 = arith.constant 0 : i32
    return %arg0, %c0_i32 : i32, i32
  }
  func.func @transform_4(%arg0: i32) -> (i32, i32) {
    %c0_i32 = arith.constant 0 : i32
    %c0_i32_0 = arith.constant 0 : i32
    return %arg0, %c0_i32 : i32, i32
  }
}

</mosaic_0001>

<bundles_post_ra>
// kernel: tpu_custom_call.1
= control target key start
LH: loop header
LB: loop body
LE: loop exit
PB: predicated region body
PF: predicated region fallthrough
CT: control target
= control target key end

     0   :  { %10 = vsyncpa [#allocation3], 0  ;;  %s308_s0 = inlined_call_operand.hbm [shape: f32[8,32], index: 0, kind: input, shape index: {}]   ;;  %s309_s1 = inlined_call_operand.hbm [shape: f32[8,32], index: 1, kind: input, shape index: {}]   ;;  %s310_s2 = inlined_call_operand.hbm [shape: f32[8,32], index: 2, kind: output, shape index: {0}]   ;;  %s311_s3 = inlined_call_operand.hbm [shape: f32[8,32], index: 3, kind: output, shape index: {1}]   ;;  %s312_s4 = inlined_call_operand.vmem [shape: f32[8,1], index: 4, kind: output, shape index: {2}]  }
   0x1   :  { %11 = vsyncpa [#allocation6], 0 }
   0x2   :  { %12 = vsyncpa [#allocation4], 0 }
   0x3   :  { %13 = vsyncpa [#allocation9], 0  ;;  %s223_s15 = smov [#allocation2]   ;;  %s224_s17 = smov [#allocation5]  }
   0x4   :  { %s20_s16 = sshll.u32 %s223_s15, 4  ;;  %s30_s18 = sshll.u32 %s224_s17, 4  ;;  %s21_s16 = int_to_ptr.vmem [resolvable:$true] %s20_s16  ;;  %s31_s18 = int_to_ptr.vmem [resolvable:$true] %s30_s18 }
   0x5   :  { %s127_s21 = scalar_lea.hbm %s308_s0, 128 }
   0x6   :  { %p128_p0 = scmp.ne.s32.totalorder %s308_s0, %s127_s21  ;;  %p131_p1 = scmp.lt.u32.totalorder %s127_s21, %s308_s0 }
   0x8   :  { %p133_p2 = pnand %p131_p1, %p128_p0 }
   0xa   :  { %136 = shalt.err (!%p133_p2)
}
   0xb   :  { %s137_s26 = scalar_lea.vmem %s21_s16, 128  ;;  %p142_p4 = scmp.lt.s32.totalorder %s21_s16, %s21_s16 }
   0xc   :  { %p138_p3 = scmp.ne.s32.totalorder %s21_s16, %s137_s26  ;;  %p143_p5 = scmp.lt.s32.totalorder %s137_s26, %s137_s26 }
   0xe   :  { %p144_p6 = por %p143_p5, %p142_p4 }
  0x10   :  { %p145_p7 = pnand %p144_p6, %p138_p3 }
  0x12   :  { %148 = shalt.err (!%p145_p7)
}
  0x13   :  { %23 = dma.hbm_to_vmem [thread:$0]  %s308_s0, 128, %s21_s16, [#allocation3]  }
  0x14   :  { %s149_s5 = scalar_lea.hbm %s309_s1, 128 }
  0x15   :  { %p150_p8 = scmp.ne.s32.totalorder %s309_s1, %s149_s5  ;;  %p153_p9 = scmp.lt.u32.totalorder %s149_s5, %s309_s1 }
  0x17   :  { %p155_p10 = pnand %p153_p9, %p150_p8 }
  0x19   :  { %158 = shalt.err (!%p155_p10)
}
  0x1a   :  { %s159_s10 = scalar_lea.vmem %s31_s18, 128  ;;  %p164_p12 = scmp.lt.s32.totalorder %s31_s18, %s31_s18 }
  0x1b   :  { %p160_p11 = scmp.ne.s32.totalorder %s31_s18, %s159_s10  ;;  %p165_p13 = scmp.lt.s32.totalorder %s159_s10, %s159_s10 }
  0x1d   :  { %p166_p0 = por %p165_p13, %p164_p12 }
  0x1f   :  { %p167_p1 = pnand %p166_p0, %p160_p11 }
  0x21   :  { %170 = shalt.err (!%p167_p1)
}
  0x22   :  { %33 = dma.hbm_to_vmem [thread:$0]  %s309_s1, 128, %s31_s18, [#allocation6]  }
  0x23   :  { %215 = dma.done.wait [#allocation3], 128  }
  0x24   :  { %216 = vsyncadd [#allocation3], 4294967168 }
  0x25   :  { %217 = dma.done.wait [#allocation6], 128  }
  0x26   :  { %218 = vsyncadd [#allocation6], 4294967168  ;;  %v40_v0 = vld [vmem:[#allocation2] sm:$0xff]  ;;  %vm43_vm0 = vcmask 261120   ;;  %v41_v1 = vld [vmem:[#allocation5] sm:$0xff]  ;;  %s225_s1 = smov [#allocation7]  }
  0x27   :  { %v42_v2 = vmul.f32 %v40_v0, %v40_v0  ;;  %v54_v3 = vmul.f32 %v41_v1, %v41_v1  ;;  %s87_s12 = sshll.u32 %s225_s1, 4  ;;  %s226_s13 = smov [#allocation8]   ;;  %s88_s12 = int_to_ptr.vmem [resolvable:$true] %s87_s12 }
  0x28   :  { %s97_s14 = sshll.u32 %s226_s13, 4  ;;  %s171_s15 = scalar_lea.vmem %s88_s12, 128  ;;  %s98_s14 = int_to_ptr.vmem [resolvable:$true] %s97_s14 }
  0x29   :  { %v44_v4 = vsel %vm43_vm0, %v42_v2, 0.0  ;;  %v55_v5 = vsel %vm43_vm0, %v54_v3, 0.0  ;;  %p172_p2 = scmp.ne.s32.totalorder %s88_s12, %s171_s15  ;;  %p176_p3 = scmp.lt.s32.totalorder %s88_s12, %s88_s12 }
  0x2a   :  { %45 = vadd.xlane.f32.xlu0 %v44_v4  ;;  %p177_p4 = scmp.lt.s32.totalorder %s171_s15, %s171_s15 }
  0x2c   :  { %p178_p5 = por %p177_p4, %p176_p3 }
  0x2e   :  { %56 = vadd.xlane.f32.xlu0 %v55_v5  ;;  %p179_p6 = pnand %p178_p5, %p172_p2 }
  0xb7   :  { %v46_v6 = vpop.xlane.xlu0 %45 }
  0xb8   :  { %119 = vrsqrt.f32 %v46_v6  ;;  %vm49_vm1 = vcmp.eq.f32.partialorder %v46_v6, inf  ;;  %v52_v10 = vand.u32 2147483648, %v46_v6  ;;  %vm51_vm2 = vcmp.eq.f32.partialorder %v46_v6, 0.0 }
  0xbb   :  { %v57_v7 = vpop.xlane.xlu0 %56 }
  0xbc   :  { %121 = vrsqrt.f32 %v57_v7  ;;  %vm60_vm3 = vcmp.eq.f32.partialorder %v57_v7, inf  ;;  %v63_v16 = vand.u32 2147483648, %v57_v7  ;;  %vm62_vm4 = vcmp.eq.f32.partialorder %v57_v7, 0.0 }
  0xc2   :  { %v120_v8 = vpop.eup %119 }
  0xc3   :  { %v48_v9 = vmul.f32 %v120_v8, %v46_v6 }
  0xc5   :  { %v50_v11 = vsel %vm49_vm1, %v46_v6, %v48_v9 }
  0xc6   :  { %v122_v12 = vpop.eup %121  ;;  %v53_v13 = vsel %vm51_vm2, %v52_v10, %v50_v11 }
  0xc7   :  { %v65_v14 = vmax.f32 %v53_v13, 1e-12  ;;  %v59_v15 = vmul.f32 %v122_v12, %v57_v7 }
  0xc9   :  { %v61_v17 = vsel %vm60_vm3, %v57_v7, %v59_v15  ;;  %123 = vrcp.f32 %v65_v14 }
  0xca   :  { %v64_v18 = vsel %vm62_vm4, %v63_v16, %v61_v17 }
  0xcb   :  { %v68_v19 = vmax.f32 %v64_v18, 1e-12 }
  0xcd   :  { %125 = vrcp.f32 %v68_v19 }
  0xd3   :  { %v124_v20 = vpop.eup %123 }
  0xd4   :  { %v67_v21 = vmul.f32 %v124_v20, %v40_v0 }
  0xd6   :  { %v77_v22 = vmul.f32 4.472136, %v67_v21 }
  0xd7   :  { %v126_v23 = vpop.eup %125 }
  0xd8   :  { %v70_v24 = vmul.f32 %v126_v23, %v41_v1  ;;  %78 = vst.msk [vmem:[#allocation7] sm:$0xff] %vm43_vm0, %v77_v22 }
  0xda   :  { %v71_v25 = vmul.f32 %v70_v24, %v67_v21  ;;  %v79_v26 = vmul.f32 4.472136, %v70_v24 }
  0xdc   :  { %v72_v27 = vsel %vm43_vm0, %v71_v25, 0.0  ;;  %80 = vst.msk [vmem:[#allocation8] sm:$0xff] %vm43_vm0, %v79_v26 }
  0xdd   :  { %73 = vadd.xlane.f32.xlu1 %v72_v27 }
  0xde   :  { %182 = shalt.err (!%p179_p6)
}
  0xdf   :  { %s183_s18 = scalar_lea.hbm %s310_s2, 128 }
  0xe0   :  { %p184_p7 = scmp.ne.s32.totalorder %s310_s2, %s183_s18  ;;  %p187_p8 = scmp.lt.u32.totalorder %s183_s18, %s310_s2 }
  0xe2   :  { %p189_p9 = pnand %p187_p8, %p184_p7 }
  0xe4   :  { %192 = shalt.err (!%p189_p9)
}
  0xe5   :  { %90 = dma.vmem_to_hbm [thread:$0]  %s88_s12, 128, %s310_s2, [#allocation4]  }
  0xe6   :  { %s193_s25 = scalar_lea.vmem %s98_s14, 128  ;;  %p198_p11 = scmp.lt.s32.totalorder %s98_s14, %s98_s14 }
  0xe7   :  { %p194_p10 = scmp.ne.s32.totalorder %s98_s14, %s193_s25  ;;  %p199_p12 = scmp.lt.s32.totalorder %s193_s25, %s193_s25 }
  0xe9   :  { %p200_p13 = por %p199_p12, %p198_p11 }
  0xeb   :  { %p201_p0 = pnand %p200_p13, %p194_p10 }
  0xed   :  { %204 = shalt.err (!%p201_p0)
}
  0xee   :  { %s205_s28 = scalar_lea.hbm %s311_s3, 128 }
  0xef   :  { %p206_p1 = scmp.ne.s32.totalorder %s311_s3, %s205_s28  ;;  %p209_p2 = scmp.lt.u32.totalorder %s205_s28, %s311_s3 }
  0xf1   :  { %p211_p3 = pnand %p209_p2, %p206_p1 }
  0xf3   :  { %214 = shalt.err (!%p211_p3)
}
  0xf4   :  { %100 = dma.vmem_to_hbm [thread:$0]  %s98_s14, 128, %s311_s3, [#allocation9]   ;;  %vm75_vm5 = vcmask 7168  }
 0x16a   :  { %v74_v28 = vpop.xlane.xlu1 %73 }
 0x16b   :  { %76 = vst.msk [vmem:[%s312_s4] sm:$0xff] %vm75_vm5, %v74_v28 }
 0x16c   :  { %219 = dma.done.wait [#allocation4], 128  }
 0x16d   :  { %220 = vsyncadd [#allocation4], 4294967168 }
 0x16e   :  { %221 = dma.done.wait [#allocation9], 128  }
 0x16f   :  { %222 = vsyncadd [#allocation9], 4294967168 }
 0x170   :  { %111 = vsyncpa [#allocation3], 1 }
 0x171   :  { %112 = vsyncpa [#allocation6], 1 }
 0x172   :  { %113 = vsyncpa [#allocation4], 1 }
 0x173   :  { %114 = vsyncpa [#allocation9], 1 }

</bundles_post_ra>
